<compile_context>
chip_gen: v7x
topology: tpu7x:2x2x1
jax: 0.10.0
libtpu: 0.0.40
codegen_flags: <defaults>
</compile_context>

<pallas_src>
import jax
import jax.numpy as jnp
from jax.experimental import pallas as pl
from jax.experimental.pallas import tpu as pltpu

# ---- model hyper-parameters (from the PyTorch module) ----------------------
DIM_ACC_LAYER_1 = 16
DIM_ACC_LAYER_2 = 16
DIM_STEER_LAYER_1_HEAD = 32
DIM_STEER_LAYER_1_TAIL = 16
DIM_STEER_LAYER_2 = 8
HIDDEN_LAYER_SIZES = (32, 16)
OUT_DIM = 6
RANDOMIZE = 0.01  # uniform init range [-randomize, randomize]

# small, self-consistent queue sizes (stand-ins for drive_functions constants)
ACC_QUEUE_SIZE = 8
STEER_QUEUE_SIZE = 12
STEER_QUEUE_SIZE_CORE = 6
INPUT_DIM = 3 + ACC_QUEUE_SIZE + STEER_QUEUE_SIZE  # 23

# index sets, exactly as in __init__
ACC_INPUT_INDEX = [1] + [i + 3 for i in range(ACC_QUEUE_SIZE)]                            # 9
STEER_INPUT_INDEX = [2] + [i + ACC_QUEUE_SIZE + 3 for i in range(STEER_QUEUE_SIZE_CORE)]  # 7
STEER_INPUT_INDEX_FULL = [i + ACC_QUEUE_SIZE + 3 for i in range(STEER_QUEUE_SIZE)]        # 12

# ---- packed-slab layout ------------------------------------------------------
LANE = 128
N_BANDS = 7
N_SLAB = N_BANDS * LANE            # 896
TB_MAX = 512                       # batch tile (rows); ~1.5 MiB/step incl. weights


def _round_up(n, m):
    return ((n + m - 1) // m) * m


# ---- Pallas kernel: the entire forward hot path -----------------------------
def drive_nn_kernel(x_ref, w_ref, b_ref, out_ref):
    x = x_ref[...]  # (TB, 23)

    def band_mm(a, band):
        k = a.shape[1]
        wb = w_ref[0:k, band * LANE:(band + 1) * LANE]   # static, lane-aligned slice
        return jnp.dot(a, wb, preferred_element_type=jnp.float32)

    def band_bias(band):
        return b_ref[:, band * LANE:(band + 1) * LANE]   # (1, 128), broadcast over rows

    # fused layer 1 (acc_layer_1 | steer_layer_1_head | steer_layer_1_tail | zeros)
    h1 = jnp.maximum(band_mm(x, 0) + band_bias(0), 0.0)            # (TB, 128), real 0:64
    # fused layer 2, block-diagonal (acc_layer_2 | steer_layer_2 | zeros)
    h2 = jnp.tanh(band_mm(h1, 1) + band_bias(1))                   # (TB, 128), real 0:24
    # linear_relu_stack[0]: cat(x[:, [0]], acc2, steer2) folded into two matmuls
    h3 = jnp.maximum(band_mm(x, 2) + band_mm(h2, 3) + band_bias(3), 0.0)   # real 0:32
    # linear_relu_stack[2]
    h4 = jnp.maximum(band_mm(h3, 4) + band_bias(4), 0.0)                   # real 0:16
    # finalize: cat(pre_pred, acc2, steer2) folded into two matmuls; lane-dense output
    out_ref[...] = band_mm(h4, 5) + band_mm(h2, 6) + band_bias(5)          # real 0:6


# ---- parameter construction (deterministic, mimics nn.init.uniform_) --------
def init_params(key):
    def uniform(k, shape):
        return jax.random.uniform(k, shape, jnp.float32, -RANDOMIZE, RANDOMIZE)

    names_shapes = [
        # weights stored as (in, out) = W.T of PyTorch's (out, in); biases as (1, out)
        ("wa1", (len(ACC_INPUT_INDEX), DIM_ACC_LAYER_1)),
        ("ba1", (1, DIM_ACC_LAYER_1)),
        ("wsh", (len(STEER_INPUT_INDEX), DIM_STEER_LAYER_1_HEAD)),
        ("bsh", (1, DIM_STEER_LAYER_1_HEAD)),
        ("wst", (len(STEER_INPUT_INDEX_FULL), DIM_STEER_LAYER_1_TAIL)),
        ("bst", (1, DIM_STEER_LAYER_1_TAIL)),
        ("wa2", (DIM_ACC_LAYER_1, DIM_ACC_LAYER_2)),
        ("ba2", (1, DIM_ACC_LAYER_2)),
        ("ws2", (DIM_STEER_LAYER_1_HEAD + DIM_STEER_LAYER_1_TAIL, DIM_STEER_LAYER_2)),
        ("bs2", (1, DIM_STEER_LAYER_2)),
        ("w1", (1 + DIM_ACC_LAYER_2 + DIM_STEER_LAYER_2, HIDDEN_LAYER_SIZES[0])),
        ("b1", (1, HIDDEN_LAYER_SIZES[0])),
        ("w2", (HIDDEN_LAYER_SIZES[0], HIDDEN_LAYER_SIZES[1])),
        ("b2", (1, HIDDEN_LAYER_SIZES[1])),
        ("wf", (HIDDEN_LAYER_SIZES[1] + DIM_ACC_LAYER_2 + DIM_STEER_LAYER_2, OUT_DIM)),
        ("bf", (1, OUT_DIM)),
    ]
    keys = jax.random.split(key, len(names_shapes))
    return {name: uniform(k, shape) for (name, shape), k in zip(names_shapes, keys)}


# ---- one-time weight packing (outside the per-call path) --------------------
def pack_params(params):
    """Pack all layers into one (128, 896) weight slab + one (1, 896) bias slab.

    Column gathers are folded in as zero rows; concat-facing layers are split into
    per-source bands; the 6-wide output is lane-padded to 128 (zero columns)."""
    acc_idx = jnp.array(ACC_INPUT_INDEX)
    sh_idx = jnp.array(STEER_INPUT_INDEX)
    st_idx = jnp.array(STEER_INPUT_INDEX_FULL)

    wslab = jnp.zeros((LANE, N_SLAB), jnp.float32)
    bslab = jnp.zeros((1, N_SLAB), jnp.float32)

    # Band 0: fused layer 1; input gathers folded in as scattered rows of a (23, 64) block.
    w1blk = jnp.zeros((INPUT_DIM, 64), jnp.float32)
    w1blk = w1blk.at[acc_idx, 0:16].set(params["wa1"])
    w1blk = w1blk.at[sh_idx, 16:48].set(params["wsh"])
    w1blk = w1blk.at[st_idx, 48:64].set(params["wst"])
    wslab = wslab.at[0:INPUT_DIM, 0:64].set(w1blk)
    bslab = bslab.at[:, 0:64].set(
        jnp.concatenate([params["ba1"], params["bsh"], params["bst"]], axis=1))

    # Band 1: fused layer 2 (block diagonal: acc on rows 0:16, steer on rows 16:64).
    w2blk = jnp.zeros((64, 24), jnp.float32)
    w2blk = w2blk.at[0:16, 0:16].set(params["wa2"])
    w2blk = w2blk.at[16:64, 16:24].set(params["ws2"])
    wslab = wslab.at[0:64, 128:152].set(w2blk)
    bslab = bslab.at[:, 128:152].set(
        jnp.concatenate([params["ba2"], params["bs2"]], axis=1))

    # Band 2: linear_relu_stack[0] contribution from x[:, 0] (row 0 of full-x weight).
    wslab = wslab.at[0:1, 2 * LANE:2 * LANE + 32].set(params["w1"][0:1, :])
    # Band 3: linear_relu_stack[0] contribution from [acc2, steer2]; bias lives here.
    wslab = wslab.at[0:24, 3 * LANE:3 * LANE + 32].set(params["w1"][1:25, :])
    bslab = bslab.at[:, 3 * LANE:3 * LANE + 32].set(params["b1"])

    # Band 4: linear_relu_stack[2].
    wslab = wslab.at[0:32, 4 * LANE:4 * LANE + 16].set(params["w2"])
    bslab = bslab.at[:, 4 * LANE:4 * LANE + 16].set(params["b2"])

    # Band 5: finalize contribution from pre_pred (output lane-padded 6 -> 128).
    wslab = wslab.at[0:16, 5 * LANE:5 * LANE + OUT_DIM].set(params["wf"][0:16, :])
    bslab = bslab.at[:, 5 * LANE:5 * LANE + OUT_DIM].set(params["bf"])
    # Band 6: finalize contribution from [acc2, steer2].
    wslab = wslab.at[0:24, 6 * LANE:6 * LANE + OUT_DIM].set(params["wf"][16:40, :])

    return wslab, bslab


# ---- wrapper: batch grid over one pallas_call --------------------------------
@jax.jit
def drive_nn_forward(x, wslab, bslab):
    batch = x.shape[0]
    tb = TB_MAX if batch > TB_MAX else max(8, _round_up(batch, 8))
    b_pad = _round_up(batch, tb)
    if b_pad != batch:
        x = jnp.pad(x, ((0, b_pad - batch), (0, 0)))

    out = pl.pallas_call(
        drive_nn_kernel,
        out_shape=jax.ShapeDtypeStruct((b_pad, LANE), jnp.float32),
        grid=(b_pad // tb,),
        in_specs=[
            pl.BlockSpec((tb, INPUT_DIM), lambda i: (i, 0)),   # batch-tiled input
            pl.BlockSpec((LANE, N_SLAB), lambda i: (0, 0)),    # weights: VMEM-resident
            pl.BlockSpec((1, N_SLAB), lambda i: (0, 0)),       # biases: VMEM-resident
        ],
        out_specs=pl.BlockSpec((tb, LANE), lambda i: (i, 0)),  # lane-dense output
        compiler_params=pltpu.CompilerParams(
            dimension_semantics=("parallel",)),
    )(x, wslab, bslab)
    return out[:batch, :OUT_DIM]


# ---- pure-JAX reference (mirrors the PyTorch forward, dropout p=0 => identity)
def drive_nn_reference(x, params):
    def lin(a, w, b):
        return a @ w + b

    acc1 = jax.nn.relu(lin(x[:, jnp.array(ACC_INPUT_INDEX)], params["wa1"], params["ba1"]))
    s_head = jax.nn.relu(lin(x[:, jnp.array(STEER_INPUT_INDEX)], params["wsh"], params["bsh"]))
    s_tail = jax.nn.relu(lin(x[:, jnp.array(STEER_INPUT_INDEX_FULL)], params["wst"], params["bst"]))
    steer1 = jnp.concatenate([s_head, s_tail], axis=1)
    acc2 = jnp.tanh(lin(acc1, params["wa2"], params["ba2"]))
    steer2 = jnp.tanh(lin(steer1, params["ws2"], params["bs2"]))
    h = jnp.concatenate([x[:, 0:1], acc2, steer2], axis=1)
    h1 = jax.nn.relu(lin(h, params["w1"], params["b1"]))
    pre = jax.nn.relu(lin(h1, params["w2"], params["b2"]))
    fin = jnp.concatenate([pre, acc2, steer2], axis=1)
    return lin(fin, params["wf"], params["bf"])


if __name__ == "__main__":
    key = jax.random.PRNGKey(0)
    k_params, k_x1, k_x2 = jax.random.split(key, 3)
    params = init_params(k_params)
    wslab, bslab = pack_params(params)   # one-time packing, outside the hot path

    # small batch (single grid step)
    x_small = jax.random.normal(k_x1, (8, INPUT_DIM), dtype=jnp.float32)
    out_small = jax.block_until_ready(drive_nn_forward(x_small, wslab, bslab))
    ref_small = drive_nn_reference(x_small, params)
    assert out_small.shape == (8, OUT_DIM)
    assert jnp.allclose(out_small, ref_small, atol=1e-5, rtol=1e-5)

    # larger batch (multi-step parallel grid + padded last tile)
    x_big = jax.random.normal(k_x2, (1280, INPUT_DIM), dtype=jnp.float32)
    out_big = jax.block_until_ready(drive_nn_forward(x_big, wslab, bslab))
    ref_big = drive_nn_reference(x_big, params)
    assert out_big.shape == (1280, OUT_DIM)
    assert jnp.allclose(out_big, ref_big, atol=1e-5, rtol=1e-5)

    # TODO(synk): training-mode Dropout (acc_dropout/steer_dropout with p>0) is not
    # implemented; forward matches the eval/inference path (p=0 identity).
    print("KERNEL_OK")
</pallas_src>

<mosaic_0001>
module attributes {stable_mosaic.version = 11 : i64} {
  func.func @drive_nn_kernel(%arg0: i32, %arg1: memref<8x23xf32, #tpu.memory_space<vmem>>, %arg2: memref<128x896xf32, #tpu.memory_space<vmem>>, %arg3: memref<1x896xf32, #tpu.memory_space<vmem>>, %arg4: memref<8x128xf32, #tpu.memory_space<vmem>>) attributes {dimension_semantics = [#tpu.dimension_semantics<parallel>], iteration_bounds = array<i64: 1>, scalar_prefetch = 0 : i64, scratch_operands = 0 : i64, tpu.core_type = #tpu.core_type<tc>, window_params = [{transform_indices = @transform_0, window_bounds = array<i64: 8, 23>}, {pipeline_mode = #tpu.pipeline_mode<synchronous>, transform_indices = @transform_1, window_bounds = array<i64: 128, 896>}, {pipeline_mode = #tpu.pipeline_mode<synchronous>, transform_indices = @transform_2, window_bounds = array<i64: 1, 896>}, {transform_indices = @transform_3, window_bounds = array<i64: 8, 128>}]} {
    %c0 = arith.constant 0 : index
    %c0_0 = arith.constant 0 : index
    %0 = vector.load %arg1[%c0, %c0_0] : memref<8x23xf32, #tpu.memory_space<vmem>>, vector<8x23xf32>
    %c0_1 = arith.constant 0 : index
    %c0_2 = arith.constant 0 : index
    %1 = vector.load %arg2[%c0_1, %c0_2] : memref<128x896xf32, #tpu.memory_space<vmem>>, vector<23x128xf32>
    %cst = arith.constant dense<0.000000e+00> : vector<8x128xf32>
    %2 = tpu.matmul %0, %1, %cst {dimension_numbers = #tpu.dot_dimension_numbers<[1], [0], [0], [1], [0, 0, 1, 1], [], []>} : vector<8x23xf32>, vector<23x128xf32>, vector<8x128xf32> -> vector<8x128xf32>
    %c0_3 = arith.constant 0 : index
    %c0_4 = arith.constant 0 : index
    %3 = vector.load %arg3[%c0_3, %c0_4] : memref<1x896xf32, #tpu.memory_space<vmem>>, vector<1x128xf32>
    %4 = vector.broadcast %3 : vector<1x128xf32> to vector<8x128xf32>
    %5 = arith.addf %2, %4 : vector<8x128xf32>
    %cst_5 = arith.constant 0.000000e+00 : f32
    %6 = vector.broadcast %cst_5 : f32 to vector<8x128xf32>
    %7 = arith.maximumf %5, %6 : vector<8x128xf32>
    %c0_6 = arith.constant 0 : index
    %c128 = arith.constant 128 : index
    %8 = vector.load %arg2[%c0_6, %c128] : memref<128x896xf32, #tpu.memory_space<vmem>>, vector<128x128xf32>
    %cst_7 = arith.constant dense<0.000000e+00> : vector<8x128xf32>
    %9 = tpu.matmul %7, %8, %cst_7 {dimension_numbers = #tpu.dot_dimension_numbers<[1], [0], [0], [1], [0, 0, 1, 1], [], []>} : vector<8x128xf32>, vector<128x128xf32>, vector<8x128xf32> -> vector<8x128xf32>
    %c0_8 = arith.constant 0 : index
    %c128_9 = arith.constant 128 : index
    %10 = vector.load %arg3[%c0_8, %c128_9] : memref<1x896xf32, #tpu.memory_space<vmem>>, vector<1x128xf32>
    %11 = vector.broadcast %10 : vector<1x128xf32> to vector<8x128xf32>
    %12 = arith.addf %9, %11 : vector<8x128xf32>
    %13 = math.tanh %12 : vector<8x128xf32>
    %c0_10 = arith.constant 0 : index
    %c256 = arith.constant 256 : index
    %14 = vector.load %arg2[%c0_10, %c256] : memref<128x896xf32, #tpu.memory_space<vmem>>, vector<23x128xf32>
    %cst_11 = arith.constant dense<0.000000e+00> : vector<8x128xf32>
    %15 = tpu.matmul %0, %14, %cst_11 {dimension_numbers = #tpu.dot_dimension_numbers<[1], [0], [0], [1], [0, 0, 1, 1], [], []>} : vector<8x23xf32>, vector<23x128xf32>, vector<8x128xf32> -> vector<8x128xf32>
    %c0_12 = arith.constant 0 : index
    %c384 = arith.constant 384 : index
    %16 = vector.load %arg2[%c0_12, %c384] : memref<128x896xf32, #tpu.memory_space<vmem>>, vector<128x128xf32>
    %cst_13 = arith.constant dense<0.000000e+00> : vector<8x128xf32>
    %17 = tpu.matmul %13, %16, %cst_13 {dimension_numbers = #tpu.dot_dimension_numbers<[1], [0], [0], [1], [0, 0, 1, 1], [], []>} : vector<8x128xf32>, vector<128x128xf32>, vector<8x128xf32> -> vector<8x128xf32>
    %18 = arith.addf %15, %17 : vector<8x128xf32>
    %c0_14 = arith.constant 0 : index
    %c384_15 = arith.constant 384 : index
    %19 = vector.load %arg3[%c0_14, %c384_15] : memref<1x896xf32, #tpu.memory_space<vmem>>, vector<1x128xf32>
    %20 = vector.broadcast %19 : vector<1x128xf32> to vector<8x128xf32>
    %21 = arith.addf %18, %20 : vector<8x128xf32>
    %cst_16 = arith.constant 0.000000e+00 : f32
    %22 = vector.broadcast %cst_16 : f32 to vector<8x128xf32>
    %23 = arith.maximumf %21, %22 : vector<8x128xf32>
    %c0_17 = arith.constant 0 : index
    %c512 = arith.constant 512 : index
    %24 = vector.load %arg2[%c0_17, %c512] : memref<128x896xf32, #tpu.memory_space<vmem>>, vector<128x128xf32>
    %cst_18 = arith.constant dense<0.000000e+00> : vector<8x128xf32>
    %25 = tpu.matmul %23, %24, %cst_18 {dimension_numbers = #tpu.dot_dimension_numbers<[1], [0], [0], [1], [0, 0, 1, 1], [], []>} : vector<8x128xf32>, vector<128x128xf32>, vector<8x128xf32> -> vector<8x128xf32>
    %c0_19 = arith.constant 0 : index
    %c512_20 = arith.constant 512 : index
    %26 = vector.load %arg3[%c0_19, %c512_20] : memref<1x896xf32, #tpu.memory_space<vmem>>, vector<1x128xf32>
    %27 = vector.broadcast %26 : vector<1x128xf32> to vector<8x128xf32>
    %28 = arith.addf %25, %27 : vector<8x128xf32>
    %cst_21 = arith.constant 0.000000e+00 : f32
    %29 = vector.broadcast %cst_21 : f32 to vector<8x128xf32>
    %30 = arith.maximumf %28, %29 : vector<8x128xf32>
    %c0_22 = arith.constant 0 : index
    %c640 = arith.constant 640 : index
    %31 = vector.load %arg2[%c0_22, %c640] : memref<128x896xf32, #tpu.memory_space<vmem>>, vector<128x128xf32>
    %cst_23 = arith.constant dense<0.000000e+00> : vector<8x128xf32>
    %32 = tpu.matmul %30, %31, %cst_23 {dimension_numbers = #tpu.dot_dimension_numbers<[1], [0], [0], [1], [0, 0, 1, 1], [], []>} : vector<8x128xf32>, vector<128x128xf32>, vector<8x128xf32> -> vector<8x128xf32>
    %c0_24 = arith.constant 0 : index
    %c768 = arith.constant 768 : index
    %33 = vector.load %arg2[%c0_24, %c768] : memref<128x896xf32, #tpu.memory_space<vmem>>, vector<128x128xf32>
    %cst_25 = arith.constant dense<0.000000e+00> : vector<8x128xf32>
    %34 = tpu.matmul %13, %33, %cst_25 {dimension_numbers = #tpu.dot_dimension_numbers<[1], [0], [0], [1], [0, 0, 1, 1], [], []>} : vector<8x128xf32>, vector<128x128xf32>, vector<8x128xf32> -> vector<8x128xf32>
    %35 = arith.addf %32, %34 : vector<8x128xf32>
    %c0_26 = arith.constant 0 : index
    %c640_27 = arith.constant 640 : index
    %36 = vector.load %arg3[%c0_26, %c640_27] : memref<1x896xf32, #tpu.memory_space<vmem>>, vector<1x128xf32>
    %37 = vector.broadcast %36 : vector<1x128xf32> to vector<8x128xf32>
    %38 = arith.addf %35, %37 : vector<8x128xf32>
    %c0_28 = arith.constant 0 : index
    %c0_29 = arith.constant 0 : index
    %39 = vector.load %arg4[%c0_28, %c0_29] : memref<8x128xf32, #tpu.memory_space<vmem>>, vector<8x128xf32>
    tpu.vector_store %arg4[%c0_28, %c0_29], %38 {strides = array<i32>} : memref<8x128xf32, #tpu.memory_space<vmem>>, vector<8x128xf32>,
    return
  }
  func.func @transform_0(%arg0: i32) -> (i32, i32) {
    %c0_i32 = arith.constant 0 : i32
    %c0_i32_0 = arith.constant 0 : i32
    return %arg0, %c0_i32 : i32, i32
  }
  func.func @transform_1(%arg0: i32) -> (i32, i32) {
    %c0_i32 = arith.constant 0 : i32
    %c0_i32_0 = arith.constant 0 : i32
    %c0_i32_1 = arith.constant 0 : i32
    return %c0_i32, %c0_i32_0 : i32, i32
  }
  func.func @transform_2(%arg0: i32) -> (i32, i32) {
    %c0_i32 = arith.constant 0 : i32
    %c0_i32_0 = arith.constant 0 : i32
    %c0_i32_1 = arith.constant 0 : i32
    return %c0_i32, %c0_i32_0 : i32, i32
  }
  func.func @transform_3(%arg0: i32) -> (i32, i32) {
    %c0_i32 = arith.constant 0 : i32
    %c0_i32_0 = arith.constant 0 : i32
    return %arg0, %c0_i32 : i32, i32
  }
}

</mosaic_0001>

<bundles_post_ra>
// kernel: drive_nn_forward.1
= control target key start
LH: loop header
LB: loop body
LE: loop exit
PB: predicated region body
PF: predicated region fallthrough
CT: control target
= control target key end

     0   :  { %8 = vsyncpa [#allocation3], 0  ;;  %s1342_s0 = inlined_call_operand.hbm [shape: f32[8,23], index: 0, kind: input, shape index: {}]   ;;  %s1343_s1 = inlined_call_operand.hbm [shape: f32[128,896], index: 1, kind: input, shape index: {}]   ;;  %s1344_s2 = inlined_call_operand.vmem [shape: f32[1,896], index: 2, kind: input, shape index: {}]   ;;  %s1345_s3 = inlined_call_operand.hbm [shape: f32[8,128], index: 3, kind: output, shape index: {}]  }
   0x1   :  { %9 = vsyncpa [#allocation6], 0 }
   0x2   :  { %10 = vsyncpa [#allocation4], 0  ;;  %s1190_s12 = smov [#allocation2]   ;;  %s1191_s14 = smov [#allocation5]  }
   0x3   :  { %s17_s13 = sshll.u32 %s1190_s12, 4  ;;  %s26_s15 = sshll.u32 %s1191_s14, 4  ;;  %s18_s13 = int_to_ptr.vmem [resolvable:$true] %s17_s13  ;;  %s1218_s15 = int_to_ptr.vmem [resolvable:$true] %s26_s15 }
   0x4   :  { %s1118_s18 = scalar_lea.hbm %s1342_s0, 128 }
   0x5   :  { %p1119_p0 = scmp.ne.s32.totalorder %s1342_s0, %s1118_s18  ;;  %p1122_p1 = scmp.lt.u32.totalorder %s1118_s18, %s1342_s0 }
   0x7   :  { %p1124_p2 = pnand %p1122_p1, %p1119_p0 }
   0x9   :  { %1127 = shalt.err (!%p1124_p2)
}
   0xa   :  { %s1128_s23 = scalar_lea.vmem %s18_s13, 128  ;;  %p1133_p4 = scmp.lt.s32.totalorder %s18_s13, %s18_s13 }
   0xb   :  { %p1129_p3 = scmp.ne.s32.totalorder %s18_s13, %s1128_s23  ;;  %p1134_p5 = scmp.lt.s32.totalorder %s1128_s23, %s1128_s23 }
   0xd   :  { %p1135_p6 = por %p1134_p5, %p1133_p4 }
   0xf   :  { %p1136_p7 = pnand %p1135_p6, %p1129_p3 }
  0x11   :  { %1139 = shalt.err (!%p1136_p7)
}
  0x12   :  { %20 = dma.hbm_to_vmem [thread:$0]  %s1342_s0, 128, %s18_s13, [#allocation3]  }
  0x13   :  { %s1140_s28 = scalar_lea.hbm %s1343_s1, 14336 }
  0x14   :  { %p1141_p8 = scmp.ne.s32.totalorder %s1343_s1, %s1140_s28  ;;  %p1144_p9 = scmp.lt.u32.totalorder %s1140_s28, %s1343_s1 }
  0x16   :  { %p1146_p10 = pnand %p1144_p9, %p1141_p8 }
  0x18   :  { %1149 = shalt.err (!%p1146_p10)
}
  0x19   :  { %s1150_s6 = scalar_lea.vmem %s1218_s15, 14336  ;;  %p1155_p12 = scmp.lt.s32.totalorder %s1218_s15, %s1218_s15 }
  0x1a   :  { %p1151_p11 = scmp.ne.s32.totalorder %s1218_s15, %s1150_s6  ;;  %p1156_p13 = scmp.lt.s32.totalorder %s1150_s6, %s1150_s6 }
  0x1c   :  { %p1157_p0 = por %p1156_p13, %p1155_p12 }
  0x1e   :  { %p1158_p1 = pnand %p1157_p0, %p1151_p11 }
  0x20   :  { %1161 = shalt.err (!%p1158_p1)
}
  0x21   :  { %s1192_s0 = smov 896   ;;  %s1193_s7 = smov 56  }
  0x22   :  { %32 = dma.hbm_to_vmem [thread:$0]  %s1343_s1, 14336, %s1218_s15, [#allocation6], %s1192_s0, %s1192_s0, %s1193_s7  }
  0x23   :  { %1184 = dma.done.wait [#allocation3], 128  }
  0x24   :  { %1185 = vsyncadd [#allocation3], 4294967168 }
  0x25   :  { %1186 = dma.done.wait [#allocation6], 14336  }
  0x26   :  { %1187 = vsyncadd [#allocation6], 4294952960  ;;  %v1194_v0 = vmov 0.0|0.0   ;;  %vm1195_vm0 = vmmov 0   ;;  %v1196_v1 = vmov 0.0   ;;  %v42_v2 = vld [vmem:[#allocation5] sm:$0xff] }
  0x27   :  { %982 = vmatprep.subr.bf16.mxu1 %v1194_v0  ;;  %795 = vmatprep.mubr.msk.f32.mxu1 %vm1195_vm0, %v1196_v1  ;;  %v43_v3 = vld [vmem:[#allocation5 + $0x38] sm:$0xff]  ;;  %v131_v5 = vld [vmem:[#allocation5 + $0x8] sm:$0xff]  ;;  %v132_v6 = vld [vmem:[#allocation5 + $0x40] sm:$0xff]  ;;  %vm56_vm1 = vcmask 1046528   ;;  %vm52_vm2 = vcmask 187392   ;;  %s1197_s19 = smov [#allocation7]  }
  0x28   :  { %1009 = vmatprep.subr.bf16.mxu0 %v1194_v0  ;;  %865 = vmatprep.mubr.msk.f32.mxu0 %vm1195_vm0, %v1196_v1  ;;  %v983_v4 = vpack.c.bf16 %v43_v3, %v42_v2  ;;  %v44_v7 = vld [vmem:[#allocation5 + $0x70] sm:$0x7f]  ;;  %v1256_v8 = vld [vmem:[#allocation2] sm:$0xff]  ;;  %v986_v9 = vpack.c.bf16 %v132_v6, %v131_v5  ;;  %v135_v13 = vld [vmem:[#allocation5 + $0xe8] sm:$0xff]  ;;  %s677_s20 = sshll.u32 %s1197_s19, 4  ;;  %s678_s20 = int_to_ptr.vmem [resolvable:$true] %s677_s20 }
  0x29   :  { %v133_v10 = vld [vmem:[#allocation5 + $0x78] sm:$0xff]  ;;  %v134_v11 = vld [vmem:[#allocation5 + $0xb0] sm:$0xff]  ;;  %v136_v14 = vld [vmem:[#allocation5 + $0x120] sm:$0xff]  ;;  %s1162_s21 = scalar_lea.vmem %s678_s20, 128  ;;  %p1167_p3 = scmp.lt.s32.totalorder %s678_s20, %s678_s20 }
  0x2a   :  { %984 = vmatpush3.bf16.msra.mxu1 %v983_v4  ;;  %v989_v12 = vpack.c.bf16 %v134_v11, %v133_v10  ;;  %v992_v15 = vpack.c.bf16 %v136_v14, %v135_v13  ;;  %v137_v16 = vld [vmem:[#allocation5 + $0x158] sm:$0xff]  ;;  %v138_v17 = vld [vmem:[#allocation5 + $0x190] sm:$0xff]  ;;  %v139_v19 = vld [vmem:[#allocation5 + $0x1c8] sm:$0xff]  ;;  %p1163_p2 = scmp.ne.s32.totalorder %s678_s20, %s1162_s21  ;;  %p1168_p4 = scmp.lt.s32.totalorder %s1162_s21, %s1162_s21 }
  0x2b   :  { %793 = vmatprep.subr.mxu1 %v1196_v1  ;;  %v995_v18 = vpack.c.bf16 %v138_v17, %v137_v16  ;;  %v140_v20 = vld [vmem:[#allocation5 + $0x200] sm:$0xff]  ;;  %v141_v22 = vld [vmem:[#allocation5 + $0x238] sm:$0xff]  ;;  %v142_v23 = vld [vmem:[#allocation5 + $0x270] sm:$0xff] }
  0x2c   :  { %v998_v21 = vpack.c.bf16 %v140_v20, %v139_v19  ;;  %v1001_v24 = vpack.c.bf16 %v142_v23, %v141_v22  ;;  %v143_v25 = vld [vmem:[#allocation5 + $0x2a8] sm:$0xff]  ;;  %v144_v26 = vld [vmem:[#allocation5 + $0x2e0] sm:$0xff]  ;;  %v145_v28 = vld [vmem:[#allocation5 + $0x318] sm:$0xff]  ;;  %p1169_p5 = por %p1168_p4, %p1167_p3 }
  0x2d   :  { %v1004_v27 = vpack.c.bf16 %v144_v26, %v143_v25  ;;  %v146_v29 = vld [vmem:[#allocation5 + $0x350] sm:$0xff]  ;;  %v228_v31 = vld [vmem:[#allocation5 + $0x18] sm:$0xff]  ;;  %v230_v34 = vld [vmem:[#allocation5 + $0x88] sm:$0xff] }
  0x2e   :  { %794 = vmatpush3.msk.msra.mxu1 %vm56_vm1, %v44_v7  ;;  %v1007_v30 = vpack.c.bf16 %v146_v29, %v145_v28  ;;  %v229_v32 = vld [vmem:[#allocation5 + $0x50] sm:$0xff]  ;;  %v231_v35 = vld [vmem:[#allocation5 + $0xc0] sm:$0xff]  ;;  %v232_v37 = vld [vmem:[#allocation5 + $0xf8] sm:$0xff]  ;;  %p1170_p6 = pnand %p1169_p5, %p1163_p2 }
  0x2f   :  { %796 = vmatmul.mubr.msk.f32.vlgmr.msra.gmra.mrb[0].mxu1 %vm52_vm2, %v1256_v8  ;;  %985 = vmatprep.subr.bf16.mxu1 %v1194_v0  ;;  %v1010_v33 = vpack.c.bf16 %v229_v32, %v228_v31  ;;  %v1013_v36 = vpack.c.bf16 %v231_v35, %v230_v34  ;;  %v233_v38 = vld [vmem:[#allocation5 + $0x130] sm:$0xff]  ;;  %v234_v40 = vld [vmem:[#allocation5 + $0x168] sm:$0xff]  ;;  %v235_v41 = vld [vmem:[#allocation5 + $0x1a0] sm:$0xff] }
  0x30   :  { %987 = vmatpush3.bf16.msra.mxu1 %v986_v9  ;;  %830 = vmatprep.mubr.msk.f32.mxu1 %vm1195_vm0, %v1196_v1  ;;  %v1016_v39 = vpack.c.bf16 %v233_v38, %v232_v37  ;;  %v1019_v42 = vpack.c.bf16 %v235_v41, %v234_v40  ;;  %v236_v43 = vld [vmem:[#allocation5 + $0x1d8] sm:$0xff]  ;;  %v237_v44 = vld [vmem:[#allocation5 + $0x210] sm:$0xff]  ;;  %v226_v48 = vld [vmem:[#allocation5 + $0x48] sm:$0xff] }
  0x31   :  { %988 = vmatprep.subr.bf16.mxu1 %v1194_v0  ;;  %1011 = vmatpush3.bf16.msra.mxu0 %v1010_v33  ;;  %v1022_v45 = vpack.c.bf16 %v237_v44, %v236_v43  ;;  %v687_v46 = vld [vmem:[%s1344_s2] ss:$0 sm:$0xff]  ;;  %v225_v47 = vld [vmem:[#allocation5 + $0x10] sm:$0xff]  ;;  %v507_v55 = vld [vmem:[#allocation5 + $0x68] sm:$0xff] }
  0x32   :  { %1012 = vmatprep.subr.bf16.mxu0 %v1194_v0  ;;  %v1034_v52 = vpack.c.bf16 %v226_v48, %v225_v47  ;;  %v506_v54 = vld [vmem:[#allocation5 + $0x30] sm:$0xff]  ;;  %v227_v56 = vld [vmem:[#allocation5 + $0x80] sm:$0x7f]  ;;  %v509_v59 = vld [vmem:[#allocation5 + $0xd8] sm:$0xff] }
  0x33   :  { %v1061_v57 = vpack.c.bf16 %v507_v55, %v506_v54  ;;  %v508_v58 = vld [vmem:[#allocation5 + $0xa0] sm:$0xff]  ;;  %v510_v61 = vld [vmem:[#allocation5 + $0x110] sm:$0xff]  ;;  %v511_v62 = vld [vmem:[#allocation5 + $0x148] sm:$0xff] }
  0x34   :  { %990 = vmatpush3.bf16.msra.mxu1 %v989_v12  ;;  %v1064_v60 = vpack.c.bf16 %v509_v59, %v508_v58  ;;  %v1067_v63 = vpack.c.bf16 %v511_v62, %v510_v61  ;;  %v512_v2 = vld [vmem:[#allocation5 + $0x180] sm:$0xff]  ;;  %v513_v3 = vld [vmem:[#allocation5 + $0x1b8] sm:$0xff]  ;;  %v514_v5 = vld [vmem:[#allocation5 + $0x1f0] sm:$0xff] }
  0x35   :  { %991 = vmatprep.subr.bf16.mxu1 %v1194_v0  ;;  %1014 = vmatpush3.bf16.msra.mxu0 %v1013_v36  ;;  %v1070_v4 = vpack.c.bf16 %v513_v3, %v512_v2  ;;  %v515_v6 = vld [vmem:[#allocation5 + $0x228] sm:$0xff]  ;;  %v239_v9 = vld [vmem:[#allocation5 + $0x280] sm:$0xff]  ;;  %v517_v12 = vld [vmem:[#allocation5 + $0x298] sm:$0xff] }
  0x36   :  { %1015 = vmatprep.subr.bf16.mxu0 %v1194_v0  ;;  %v1073_v7 = vpack.c.bf16 %v515_v6, %v514_v5  ;;  %v516_v10 = vld [vmem:[#allocation5 + $0x260] sm:$0xff]  ;;  %v240_v14 = vld [vmem:[#allocation5 + $0x2b8] sm:$0xff]  ;;  %v518_v16 = vld [vmem:[#allocation5 + $0x2d0] sm:$0xff] }
  0x37   :  { %v1076_v13 = vpack.c.bf16 %v517_v12, %v516_v10  ;;  %v242_v19 = vld [vmem:[#allocation5 + $0x328] sm:$0xff]  ;;  %v243_v20 = vld [vmem:[#allocation5 + $0x360] sm:$0xff]  ;;  %v521_v23 = vld [vmem:[#allocation5 + $0x378] sm:$0xff] }
  0x38   :  { %993 = vmatpush3.bf16.msra.mxu1 %v992_v15  ;;  %v241_v15 = vld [vmem:[#allocation5 + $0x2f0] sm:$0xff]  ;;  %v520_v22 = vld [vmem:[#allocation5 + $0x340] sm:$0xff]  ;;  %v690_v26 = vld [vmem:[%s1344_s2 + $0x1] ss:$0 sm:$0xff] }
  0x39   :  { %994 = vmatprep.subr.bf16.mxu1 %v1194_v0  ;;  %1017 = vmatpush3.bf16.msra.mxu0 %v1016_v39  ;;  %v1028_v17 = vpack.c.bf16 %v241_v15, %v240_v14  ;;  %v1082_v25 = vpack.c.bf16 %v521_v23, %v520_v22  ;;  %v396_v32 = vld [vmem:[#allocation5 + $0x20] sm:$0xff]  ;;  %v397_v33 = vld [vmem:[#allocation5 + $0x58] sm:$0xff]  ;;  %v398_v35 = vld [vmem:[#allocation5 + $0x90] sm:$0xff] }
  0x3a   :  { %1018 = vmatprep.subr.bf16.mxu0 %v1194_v0  ;;  %v1037_v34 = vpack.c.bf16 %v397_v33, %v396_v32  ;;  %v399_v36 = vld [vmem:[#allocation5 + $0xc8] sm:$0xff]  ;;  %v400_v39 = vld [vmem:[#allocation5 + $0x100] sm:$0xff]  ;;  %v401_v40 = vld [vmem:[#allocation5 + $0x138] sm:$0xff] }
  0x3b   :  { %v1040_v38 = vpack.c.bf16 %v399_v36, %v398_v35  ;;  %v1043_v41 = vpack.c.bf16 %v401_v40, %v400_v39  ;;  %v403_v43 = vld [vmem:[#allocation5 + $0x1a8] sm:$0xff]  ;;  %v406_v48 = vld [vmem:[#allocation5 + $0x250] sm:$0xff]  ;;  %v693_v58 = vld [vmem:[%s1344_s2 + $0x3] ss:$0 sm:$0xff] }
  0x3c   :  { %996 = vmatpush3.bf16.msra.mxu1 %v995_v18  ;;  %v519_v18 = vld [vmem:[#allocation5 + $0x308] sm:$0xff]  ;;  %v410_v54 = vld [vmem:[#allocation5 + $0x330] sm:$0xff]  ;;  %v491_v2 = vld [vmem:[#allocation5 + $0x60] sm:$0xff] }
  0x3d   :  { %997 = vmatprep.subr.bf16.mxu1 %v1194_v0  ;;  %1020 = vmatpush3.bf16.msra.mxu0 %v1019_v42  ;;  %v402_v42 = vld [vmem:[#allocation5 + $0x170] sm:$0xff]  ;;  %v411_v55 = vld [vmem:[#allocation5 + $0x368] sm:$0xff]  ;;  %v492_v6 = vld [vmem:[#allocation5 + $0x98] sm:$0xff] }
  0x3e   :  { %1021 = vmatprep.subr.bf16.mxu0 %v1194_v0  ;;  %v1046_v44 = vpack.c.bf16 %v403_v43, %v402_v42  ;;  %v495_v10 = vld [vmem:[#allocation5 + $0x140] sm:$0xff]  ;;  %v496_v12 = vld [vmem:[#allocation5 + $0x178] sm:$0xff]  ;;  %v498_v15 = vld [vmem:[#allocation5 + $0x1e8] sm:$0xff] }
  0x3f   :  { %v504_v23 = vld [vmem:[#allocation5 + $0x338] sm:$0xff] }
  0x40   :  { %999 = vmatpush3.bf16.msra.mxu1 %v998_v21  ;;  %v1079_v21 = vpack.c.bf16 %v519_v18, %v518_v16  ;;  %v499_v16 = vld [vmem:[#allocation5 + $0x220] sm:$0xff]  ;;  %v501_v18 = vld [vmem:[#allocation5 + $0x290] sm:$0xff]  ;;  %v695_v32 = vld [vmem:[%s1344_s2 + $0x5] ss:$0 sm:$0xff] }
  0x41   :  { %1000 = vmatprep.subr.bf16.mxu1 %v1194_v0  ;;  %1023 = vmatpush3.bf16.msra.mxu0 %v1022_v45  ;;  %v404_v45 = vld [vmem:[#allocation5 + $0x1e0] sm:$0xff] }
  0x42   :  { %1024 = vmatprep.subr.bf16.mxu0 %v1194_v0 }
  0x44   :  { %1002 = vmatpush3.bf16.msra.mxu1 %v1001_v24  ;;  %v1031_v24 = vpack.c.bf16 %v243_v20, %v242_v19  ;;  %v502_v20 = vld [vmem:[#allocation5 + $0x2c8] sm:$0xff] }
  0x45   :  { %1003 = vmatprep.subr.bf16.mxu1 %v1194_v0 }
  0x48   :  { %1005 = vmatpush3.bf16.msra.mxu1 %v1004_v27 }
  0x49   :  { %1006 = vmatprep.subr.bf16.mxu1 %v1194_v0 }
  0x4c   :  { %1008 = vmatpush3.bf16.msra.mxu1 %v1007_v30 }
  0x4d   :  { %1033 = vmatprep.subr.bf16.mxu1 %v1194_v0 }
 0x102   :  { %v126_v49 = vpop.f32.mrb[0].mxu1 }
 0x103   :  { %v127_v50 = vadd.f32 %v687_v46, %v126_v49  ;;  %v797_v51 = vpop.f32.mrb[1].mxu1  ;;  %v405_v46 = vld [vmem:[#allocation5 + $0x218] sm:$0xff]  ;;  %v407_v49 = vld [vmem:[#allocation5 + $0x288] sm:$0xff] }
 0x104   :  { %v1049_v47 = vpack.c.bf16 %v405_v46, %v404_v45  ;;  %v408_v51 = vld [vmem:[#allocation5 + $0x2c0] sm:$0xff] }
 0x105   :  { %v130_v53 = vmax.f32 %v127_v50, 0.0  ;;  %v1052_v50 = vpack.c.bf16 %v407_v49, %v406_v48 }
 0x107   :  { %831 = vmatmul.mubr.f32.vlgmr.msra.gmra.mrb[2].mxu1 %v130_v53 }
 0x108   :  { %1035 = vmatpush3.bf16.msra.mxu1 %v1034_v52  ;;  %874 = vmatprep.mubr.msk.f32.mxu1 %vm1195_vm0, %v1196_v1  ;;  %v409_v52 = vld [vmem:[#allocation5 + $0x2f8] sm:$0xff] }
 0x109   :  { %872 = vmatprep.subr.mxu1 %v1196_v1  ;;  %v1055_v53 = vpack.c.bf16 %v409_v52, %v408_v51 }
 0x10c   :  { %873 = vmatpush3.msk.msra.mxu1 %vm56_vm1, %v227_v56  ;;  %v1058_v56 = vpack.c.bf16 %v411_v55, %v410_v54 }
 0x10d   :  { %1060 = vmatprep.subr.bf16.mxu1 %v1194_v0  ;;  %875 = vmatmul.mubr.msk.f32.vlgmr.msra.gmra.mrb[4].mxu1 %vm52_vm2, %v1256_v8  ;;  %v238_v8 = vld [vmem:[#allocation5 + $0x248] sm:$0xff] }
 0x10e   :  { %1062 = vmatpush3.bf16.msra.mxu1 %v1061_v57  ;;  %944 = vmatprep.mubr.msk.f32.mxu1 %vm1195_vm0, %v1196_v1  ;;  %v1025_v11 = vpack.c.bf16 %v239_v9, %v238_v8  ;;  %v494_v9 = vld [vmem:[#allocation5 + $0x108] sm:$0xff] }
 0x10f   :  { %1063 = vmatprep.subr.bf16.mxu1 %v1194_v0 }
 0x110   :  { %1026 = vmatpush3.bf16.msra.mxu0 %v1025_v11  ;;  %v1091_v11 = vpack.c.bf16 %v495_v10, %v494_v9 }
 0x111   :  { %1027 = vmatprep.subr.bf16.mxu0 %v1194_v0 }
 0x112   :  { %1065 = vmatpush3.bf16.msra.mxu1 %v1064_v60 }
 0x113   :  { %1066 = vmatprep.subr.bf16.mxu1 %v1194_v0 }
 0x114   :  { %1029 = vmatpush3.bf16.msra.mxu0 %v1028_v17  ;;  %v1097_v17 = vpack.c.bf16 %v499_v16, %v498_v15 }
 0x115   :  { %1030 = vmatprep.subr.bf16.mxu0 %v1194_v0 }
 0x116   :  { %1068 = vmatpush3.bf16.msra.mxu1 %v1067_v63  ;;  %v490_v63 = vld [vmem:[#allocation5 + $0x28] sm:$0xff] }
 0x117   :  { %1069 = vmatprep.subr.bf16.mxu1 %v1194_v0 }
 0x118   :  { %1032 = vmatpush3.bf16.msra.mxu0 %v1031_v24  ;;  %v505_v24 = vld [vmem:[#allocation5 + $0x370] sm:$0xff] }
 0x119   :  { %1036 = vmatprep.subr.bf16.mxu0 %v1194_v0 }
 0x11a   :  { %1071 = vmatpush3.bf16.msra.mxu1 %v1070_v4  ;;  %v1085_v4 = vpack.c.bf16 %v491_v2, %v490_v63 }
 0x11b   :  { %1072 = vmatprep.subr.bf16.mxu1 %v1194_v0 }
 0x11e   :  { %1074 = vmatpush3.bf16.msra.mxu1 %v1073_v7  ;;  %v493_v7 = vld [vmem:[#allocation5 + $0xd0] sm:$0xff] }
 0x11f   :  { %1075 = vmatprep.subr.bf16.mxu1 %v1194_v0  ;;  %v1088_v8 = vpack.c.bf16 %v493_v7, %v492_v6 }
 0x122   :  { %1077 = vmatpush3.bf16.msra.mxu1 %v1076_v13  ;;  %v497_v13 = vld [vmem:[#allocation5 + $0x1b0] sm:$0xff] }
 0x123   :  { %1078 = vmatprep.subr.bf16.mxu1 %v1194_v0  ;;  %v1094_v14 = vpack.c.bf16 %v497_v13, %v496_v12 }
 0x126   :  { %1080 = vmatpush3.bf16.msra.mxu1 %v1079_v21  ;;  %v503_v21 = vld [vmem:[#allocation5 + $0x300] sm:$0xff] }
 0x127   :  { %1081 = vmatprep.subr.bf16.mxu1 %v1194_v0  ;;  %v1103_v22 = vpack.c.bf16 %v503_v21, %v502_v20 }
 0x12a   :  { %1083 = vmatpush3.bf16.msra.mxu1 %v1082_v25  ;;  %v1106_v25 = vpack.c.bf16 %v505_v24, %v504_v23 }
 0x1da   :  { %v220_v27 = vpop.f32.mrb[2].mxu1 }
 0x1db   :  { %v221_v28 = vadd.f32 %v690_v26, %v220_v27  ;;  %v832_v29 = vpop.f32.mrb[3].mxu1  ;;  %v694_v26 = vld [vmem:[%s1344_s2 + $0x4] ss:$0 sm:$0xff] }
 0x1dd   :  { %1116 = vtanh.f32 %v221_v28 }
 0x1e0   :  { %v383_v30 = vpop.f32.mrb[4].mxu1 }
 0x1e1   :  { %v876_v31 = vpop.f32.mrb[5].mxu1 }
 0x1e7   :  { %v1117_v37 = vpop.eup %1116 }
 0x1e8   :  { %866 = vmatmul.mubr.f32.vlgmr.msra.gmra.mrb[0].mxu0 %v1117_v37  ;;  %945 = vmatmul.mubr.f32.vlgmr.msra.gmra.mrb[6].mxu1 %v1117_v37 }
 0x1e9   :  { %1038 = vmatpush3.bf16.msra.mxu0 %v1037_v34  ;;  %909 = vmatprep.mubr.msk.f32.mxu0 %vm1195_vm0, %v1196_v1 }
 0x1ea   :  { %1039 = vmatprep.subr.bf16.mxu0 %v1194_v0 }
 0x1ed   :  { %1041 = vmatpush3.bf16.msra.mxu0 %v1040_v38 }
 0x1ee   :  { %1042 = vmatprep.subr.bf16.mxu0 %v1194_v0 }
 0x1f1   :  { %1044 = vmatpush3.bf16.msra.mxu0 %v1043_v41 }
 0x1f2   :  { %1045 = vmatprep.subr.bf16.mxu0 %v1194_v0 }
 0x1f5   :  { %1047 = vmatpush3.bf16.msra.mxu0 %v1046_v44 }
 0x1f6   :  { %1048 = vmatprep.subr.bf16.mxu0 %v1194_v0 }
 0x1f9   :  { %1050 = vmatpush3.bf16.msra.mxu0 %v1049_v47 }
 0x1fa   :  { %1051 = vmatprep.subr.bf16.mxu0 %v1194_v0 }
 0x1fd   :  { %1053 = vmatpush3.bf16.msra.mxu0 %v1052_v50 }
 0x1fe   :  { %1054 = vmatprep.subr.bf16.mxu0 %v1194_v0 }
 0x201   :  { %1056 = vmatpush3.bf16.msra.mxu0 %v1055_v53 }
 0x202   :  { %1057 = vmatprep.subr.bf16.mxu0 %v1194_v0 }
 0x205   :  { %1059 = vmatpush3.bf16.msra.mxu0 %v1058_v56 }
 0x206   :  { %1084 = vmatprep.subr.bf16.mxu0 %v1194_v0 }
 0x2bb   :  { %v310_v57 = vpop.f32.mrb[0].mxu0  ;;  %v588_v59 = vpop.f32.mrb[6].mxu1 }
 0x2bc   :  { %v384_v60 = vadd.f32 %v383_v30, %v310_v57  ;;  %v867_v61 = vpop.f32.mrb[1].mxu0  ;;  %v946_v62 = vpop.f32.mrb[7].mxu1 }
 0x2be   :  { %v394_v3 = vadd.f32 %v693_v58, %v384_v60 }
 0x2c0   :  { %v395_v5 = vmax.f32 %v394_v3, 0.0 }
 0x2c2   :  { %910 = vmatmul.mubr.f32.vlgmr.msra.gmra.mrb[2].mxu0 %v395_v5 }
 0x2c3   :  { %1086 = vmatpush3.bf16.msra.mxu0 %v1085_v4  ;;  %979 = vmatprep.mubr.msk.f32.mxu0 %vm1195_vm0, %v1196_v1  ;;  %v500_v1 = vld [vmem:[#allocation5 + $0x258] sm:$0xff] }
 0x2c4   :  { %1087 = vmatprep.subr.bf16.mxu0 %v1194_v0  ;;  %v1100_v19 = vpack.c.bf16 %v501_v18, %v500_v1 }
 0x2c7   :  { %1089 = vmatpush3.bf16.msra.mxu0 %v1088_v8 }
 0x2c8   :  { %1090 = vmatprep.subr.bf16.mxu0 %v1194_v0 }
 0x2cb   :  { %1092 = vmatpush3.bf16.msra.mxu0 %v1091_v11 }
 0x2cc   :  { %1093 = vmatprep.subr.bf16.mxu0 %v1194_v0 }
 0x2cf   :  { %1095 = vmatpush3.bf16.msra.mxu0 %v1094_v14 }
 0x2d0   :  { %1096 = vmatprep.subr.bf16.mxu0 %v1194_v0 }
 0x2d3   :  { %1098 = vmatpush3.bf16.msra.mxu0 %v1097_v17 }
 0x2d4   :  { %1099 = vmatprep.subr.bf16.mxu0 %v1194_v0 }
 0x2d7   :  { %1101 = vmatpush3.bf16.msra.mxu0 %v1100_v19 }
 0x2d8   :  { %1102 = vmatprep.subr.bf16.mxu0 %v1194_v0 }
 0x2db   :  { %1104 = vmatpush3.bf16.msra.mxu0 %v1103_v22 }
 0x2dc   :  { %1105 = vmatprep.subr.bf16.mxu0 %v1194_v0 }
 0x2df   :  { %1107 = vmatpush3.bf16.msra.mxu0 %v1106_v25 }
 0x395   :  { %v485_v27 = vpop.f32.mrb[2].mxu0 }
 0x396   :  { %v486_v28 = vadd.f32 %v694_v26, %v485_v27  ;;  %v911_v29 = vpop.f32.mrb[3].mxu0 }
 0x398   :  { %v489_v30 = vmax.f32 %v486_v28, 0.0 }
 0x39a   :  { %980 = vmatmul.mubr.f32.vlgmr.msra.gmra.mrb[4].mxu0 %v489_v30 }
 0x46d   :  { %v658_v31 = vpop.f32.mrb[4].mxu0 }
 0x46e   :  { %v659_v0 = vadd.f32 %v658_v31, %v588_v59  ;;  %v981_v33 = vpop.f32.mrb[5].mxu0 }
 0x470   :  { %v669_v34 = vadd.f32 %v695_v32, %v659_v0 }
 0x472   :  { %670 = vst [vmem:[#allocation7] sm:$0xff] %v669_v34 }
 0x473   :  { %1173 = shalt.err (!%p1170_p6)
}
 0x474   :  { %s1174_s24 = scalar_lea.hbm %s1345_s3, 128 }
 0x475   :  { %p1175_p7 = scmp.ne.s32.totalorder %s1345_s3, %s1174_s24  ;;  %p1178_p8 = scmp.lt.u32.totalorder %s1174_s24, %s1345_s3 }
 0x477   :  { %p1180_p9 = pnand %p1178_p8, %p1175_p7 }
 0x479   :  { %1183 = shalt.err (!%p1180_p9)
}
 0x47a   :  { %680 = dma.vmem_to_hbm [thread:$0]  %s678_s20, 128, %s1345_s3, [#allocation4]  }
 0x47b   :  { %1188 = dma.done.wait [#allocation4], 128  }
 0x47c   :  { %1189 = vsyncadd [#allocation4], 4294967168 }
 0x47d   :  { %684 = vsyncpa [#allocation3], 1 }
 0x47e   :  { %685 = vsyncpa [#allocation6], 1 }
 0x47f   :  { %686 = vsyncpa [#allocation4], 1 }

</bundles_post_ra>
